<compile_context>
chip_gen: v6e
topology: v6e:2x2x1
jax: 0.10.0
libtpu: 0.0.40
codegen_flags: <defaults>
</compile_context>

<pallas_src>
import functools

import jax
import jax.numpy as jnp
from jax import lax
from jax.experimental import pallas as pl
from jax.experimental.pallas import tpu as pltpu


def _leaky_relu(x, negative_slope=0.01):
    return jnp.where(x > 0, x, negative_slope * x)


def _softplus(x):
    # Numerically stable softplus, matches torch.nn.functional.softplus.
    return jnp.maximum(x, 0.0) + jnp.log1p(jnp.exp(-jnp.abs(x)))


def _round_up(n, m):
    return ((n + m - 1) // m) * m


def mdn_forward_kernel(x_ref,
                       w1_ref, b1_ref,
                       w2_ref, b2_ref,
                       w3_ref, b3_ref,
                       out_ref,
                       *, n_components, compute_dtype):
    # MXU operands in compute_dtype (f32 or bf16); accumulate + activations in f32.
    x = x_ref[...].astype(compute_dtype)

    # ---- MLP: Linear -> LeakyReLU -> Linear -> LeakyReLU -> Linear ----
    h1 = jnp.dot(x, w1_ref[...], preferred_element_type=jnp.float32) + b1_ref[...]
    h1 = _leaky_relu(h1).astype(compute_dtype)

    h2 = jnp.dot(h1, w2_ref[...], preferred_element_type=jnp.float32) + b2_ref[...]
    h2 = _leaky_relu(h2).astype(compute_dtype)

    p = jnp.dot(h2, w3_ref[...], preferred_element_type=jnp.float32) + b3_ref[...]

    # ---- MDN head, computed full-width with lane masks (no concatenate) ----
    k = n_components
    lane = lax.broadcasted_iota(jnp.int32, p.shape, 1)
    is_pi = lane < k
    is_mu = (lane >= k) & (lane < 2 * k)

    # Segmented softmax over the first k lanes only (exact division so the
    # mixture weights sum to 1, matching jax.nn.softmax / torch softmax).
    logits = jnp.where(is_pi, p, jnp.float32(-1e30))
    m = jnp.max(logits, axis=1, keepdims=True)
    e = jnp.where(is_pi, jnp.exp(logits - m), 0.0)
    denom = jnp.sum(e, axis=1, keepdims=True)
    pis = e / denom

    sig = _softplus(p)  # only the last k lanes of this are kept

    out = jnp.where(is_pi, pis, jnp.where(is_mu, p, sig))
    out_ref[...] = out.astype(out_ref.dtype)


def mdn_forward(x, params, n_components, *, tile_m=2048,
                compute_dtype=jnp.float32, out_dtype=jnp.float32):
    """params: list of (W, b) with W shape (d_in, d_out), b shape (1, d_out)."""
    (w1, b1), (w2, b2), (w3, b3) = params
    N, d_in = x.shape
    out_dim = w3.shape[-1]
    assert out_dim == 3 * n_components

    # Weights in compute_dtype (tiny + VMEM-resident -> wrapper cast is cheap);
    # biases stay f32.  x is passed as-is and cast per-tile inside the kernel.
    w1c, w2c, w3c = (w.astype(compute_dtype) for w in (w1, w2, w3))
    b1f, b2f, b3f = (b.astype(jnp.float32) for b in (b1, b2, b3))

    # Batch tile: multiple of 8 (sublane), capped so that large-N grids get at
    # least 2 steps (so v7x's 2 TensorCores both get work via "parallel").
    tm = max(8, min(tile_m, _round_up(pl.cdiv(N, 2), 8)))
    grid = (pl.cdiv(N, tm),)

    def resident(shp):
        # Weights / biases: same block every grid step -> stay VMEM-resident.
        return pl.BlockSpec(shp, lambda i: (0,) * len(shp))

    kernel = functools.partial(mdn_forward_kernel,
                               n_components=n_components,
                               compute_dtype=compute_dtype)

    return pl.pallas_call(
        kernel,
        out_shape=jax.ShapeDtypeStruct((N, out_dim), out_dtype),
        grid=grid,
        in_specs=[
            pl.BlockSpec((tm, d_in), lambda i: (i, 0)),
            resident(w1c.shape), resident(b1f.shape),
            resident(w2c.shape), resident(b2f.shape),
            resident(w3c.shape), resident(b3f.shape),
        ],
        out_specs=pl.BlockSpec((tm, out_dim), lambda i: (i, 0)),
        compiler_params=pltpu.CompilerParams(
            dimension_semantics=("parallel",),   # shards batch across v7x's 2 TCs
        ),
    )(x, w1c, b1f, w2c, b2f, w3c, b3f)


def init_params(key, layer_sizes, n_components):
    """Deterministic init mimicking torch.nn.Linear (U[-1/sqrt(fan_in), 1/sqrt(fan_in)])."""
    sizes = list(layer_sizes) + [3 * n_components]
    params = []
    for i in range(len(sizes) - 1):
        d_in, d_out = sizes[i], sizes[i + 1]
        key, kw, kb = jax.random.split(key, 3)
        bound = 1.0 / jnp.sqrt(float(d_in))
        w = jax.random.uniform(kw, (d_in, d_out), jnp.float32, -bound, bound)
        b = jax.random.uniform(kb, (1, d_out), jnp.float32, -bound, bound)
        params.append((w, b))
    return params


def mdn_forward_reference(x, params, n_components, compute_dtype=jnp.float32):
    """Plain-JAX reference of the PyTorch forward (eval mode), mirroring the
    kernel's operand dtype policy (compute_dtype MXU operands, f32 accumulate)."""
    (w1, b1), (w2, b2), (w3, b3) = params
    cd = compute_dtype
    h = _leaky_relu(jnp.dot(x.astype(cd), w1.astype(cd),
                            preferred_element_type=jnp.float32) + b1)
    h = _leaky_relu(jnp.dot(h.astype(cd), w2.astype(cd),
                            preferred_element_type=jnp.float32) + b2)
    p = jnp.dot(h.astype(cd), w3.astype(cd),
                preferred_element_type=jnp.float32) + b3
    k = n_components
    pis = jax.nn.softmax(p[:, :k], axis=1)
    mus = p[:, k:2 * k]
    sig = jax.nn.softplus(p[:, 2 * k:])
    return jnp.concatenate([pis, mus, sig], axis=1)


if __name__ == "__main__":
    layer_sizes = [16, 32, 32]
    n_components = 4

    key = jax.random.PRNGKey(0)
    key, kp = jax.random.split(key)
    params = init_params(kp, layer_sizes, n_components)

    # ---- small f32 check at module-scale shape ----
    key, kx = jax.random.split(key)
    x_small = jax.random.normal(kx, (8, layer_sizes[0]), jnp.float32)
    out = jax.block_until_ready(mdn_forward(x_small, params, n_components))
    ref = mdn_forward_reference(x_small, params, n_components)
    assert out.shape == (8, 3 * n_components)
    assert jnp.allclose(out, ref, atol=1e-4, rtol=1e-4), "f32 mismatch vs reference"
    assert jnp.allclose(jnp.sum(out[:, :n_components], axis=1), 1.0, atol=1e-4)

    # ---- tiled bf16-operand path (exercises batch grid + resident weights) ----
    key, kx2 = jax.random.split(key)
    x_big = jax.random.normal(kx2, (512, layer_sizes[0]), jnp.float32)
    out_bf = jax.block_until_ready(
        mdn_forward(x_big, params, n_components, tile_m=2048,
                    compute_dtype=jnp.bfloat16))
    ref_bf = mdn_forward_reference(x_big, params, n_components,
                                   compute_dtype=jnp.bfloat16)
    assert out_bf.shape == (512, 3 * n_components)
    assert jnp.allclose(out_bf, ref_bf, atol=3e-3, rtol=3e-3), "bf16 mismatch vs reference"
    assert jnp.allclose(jnp.sum(out_bf[:, :n_components], axis=1), 1.0, atol=1e-3)

    print("KERNEL_OK")
</pallas_src>

<mosaic_0001>
module attributes {stable_mosaic.version = 11 : i64} {
  func.func @mdn_forward_kernel(%arg0: i32, %arg1: memref<8x16xf32, #tpu.memory_space<vmem>>, %arg2: memref<16x32xf32, #tpu.memory_space<vmem>>, %arg3: memref<1x32xf32, #tpu.memory_space<vmem>>, %arg4: memref<32x32xf32, #tpu.memory_space<vmem>>, %arg5: memref<1x32xf32, #tpu.memory_space<vmem>>, %arg6: memref<32x12xf32, #tpu.memory_space<vmem>>, %arg7: memref<1x12xf32, #tpu.memory_space<vmem>>, %arg8: memref<8x12xf32, #tpu.memory_space<vmem>>) attributes {dimension_semantics = [#tpu.dimension_semantics<parallel>], iteration_bounds = array<i64: 1>, scalar_prefetch = 0 : i64, scratch_operands = 0 : i64, tpu.core_type = #tpu.core_type<tc>, window_params = [{transform_indices = @transform_0, window_bounds = array<i64: 8, 16>}, {pipeline_mode = #tpu.pipeline_mode<synchronous>, transform_indices = @transform_1, window_bounds = array<i64: 16, 32>}, {pipeline_mode = #tpu.pipeline_mode<synchronous>, transform_indices = @transform_2, window_bounds = array<i64: 1, 32>}, {pipeline_mode = #tpu.pipeline_mode<synchronous>, transform_indices = @transform_3, window_bounds = array<i64: 32, 32>}, {pipeline_mode = #tpu.pipeline_mode<synchronous>, transform_indices = @transform_4, window_bounds = array<i64: 1, 32>}, {pipeline_mode = #tpu.pipeline_mode<synchronous>, transform_indices = @transform_5, window_bounds = array<i64: 32, 12>}, {pipeline_mode = #tpu.pipeline_mode<synchronous>, transform_indices = @transform_6, window_bounds = array<i64: 1, 12>}, {transform_indices = @transform_7, window_bounds = array<i64: 8, 12>}]} {
    %c0 = arith.constant 0 : index
    %c0_0 = arith.constant 0 : index
    %0 = vector.load %arg1[%c0, %c0_0] : memref<8x16xf32, #tpu.memory_space<vmem>>, vector<8x16xf32>
    %c0_1 = arith.constant 0 : index
    %c0_2 = arith.constant 0 : index
    %1 = vector.load %arg2[%c0_1, %c0_2] : memref<16x32xf32, #tpu.memory_space<vmem>>, vector<16x32xf32>
    %cst = arith.constant dense<0.000000e+00> : vector<8x32xf32>
    %2 = tpu.matmul %0, %1, %cst {dimension_numbers = #tpu.dot_dimension_numbers<[1], [0], [0], [1], [0, 0, 1, 1], [], []>} : vector<8x16xf32>, vector<16x32xf32>, vector<8x32xf32> -> vector<8x32xf32>
    %c0_3 = arith.constant 0 : index
    %c0_4 = arith.constant 0 : index
    %3 = vector.load %arg3[%c0_3, %c0_4] : memref<1x32xf32, #tpu.memory_space<vmem>>, vector<1x32xf32>
    %4 = vector.broadcast %3 : vector<1x32xf32> to vector<8x32xf32>
    %5 = arith.addf %2, %4 : vector<8x32xf32>
    %cst_5 = arith.constant 0.000000e+00 : f32
    %6 = vector.broadcast %cst_5 : f32 to vector<8x32xf32>
    %7 = arith.cmpf ogt, %5, %6 : vector<8x32xf32>
    %cst_6 = arith.constant 0.00999999977 : f32
    %8 = vector.broadcast %cst_6 : f32 to vector<8x32xf32>
    %9 = arith.mulf %8, %5 : vector<8x32xf32>
    %10 = arith.select %7, %5, %9 : vector<8x32xi1>, vector<8x32xf32>
    %c0_7 = arith.constant 0 : index
    %c0_8 = arith.constant 0 : index
    %11 = vector.load %arg4[%c0_7, %c0_8] : memref<32x32xf32, #tpu.memory_space<vmem>>, vector<32x32xf32>
    %cst_9 = arith.constant dense<0.000000e+00> : vector<8x32xf32>
    %12 = tpu.matmul %10, %11, %cst_9 {dimension_numbers = #tpu.dot_dimension_numbers<[1], [0], [0], [1], [0, 0, 1, 1], [], []>} : vector<8x32xf32>, vector<32x32xf32>, vector<8x32xf32> -> vector<8x32xf32>
    %c0_10 = arith.constant 0 : index
    %c0_11 = arith.constant 0 : index
    %13 = vector.load %arg5[%c0_10, %c0_11] : memref<1x32xf32, #tpu.memory_space<vmem>>, vector<1x32xf32>
    %14 = vector.broadcast %13 : vector<1x32xf32> to vector<8x32xf32>
    %15 = arith.addf %12, %14 : vector<8x32xf32>
    %cst_12 = arith.constant 0.000000e+00 : f32
    %16 = vector.broadcast %cst_12 : f32 to vector<8x32xf32>
    %17 = arith.cmpf ogt, %15, %16 : vector<8x32xf32>
    %cst_13 = arith.constant 0.00999999977 : f32
    %18 = vector.broadcast %cst_13 : f32 to vector<8x32xf32>
    %19 = arith.mulf %18, %15 : vector<8x32xf32>
    %20 = arith.select %17, %15, %19 : vector<8x32xi1>, vector<8x32xf32>
    %c0_14 = arith.constant 0 : index
    %c0_15 = arith.constant 0 : index
    %21 = vector.load %arg6[%c0_14, %c0_15] : memref<32x12xf32, #tpu.memory_space<vmem>>, vector<32x12xf32>
    %cst_16 = arith.constant dense<0.000000e+00> : vector<8x12xf32>
    %22 = tpu.matmul %20, %21, %cst_16 {dimension_numbers = #tpu.dot_dimension_numbers<[1], [0], [0], [1], [0, 0, 1, 1], [], []>} : vector<8x32xf32>, vector<32x12xf32>, vector<8x12xf32> -> vector<8x12xf32>
    %c0_17 = arith.constant 0 : index
    %c0_18 = arith.constant 0 : index
    %23 = vector.load %arg7[%c0_17, %c0_18] : memref<1x12xf32, #tpu.memory_space<vmem>>, vector<1x12xf32>
    %24 = vector.broadcast %23 : vector<1x12xf32> to vector<8x12xf32>
    %25 = arith.addf %22, %24 : vector<8x12xf32>
    %26 = tpu.iota {dimensions = array<i32: 1>} : vector<8x12xi32>
    %c4_i32 = arith.constant 4 : i32
    %27 = vector.broadcast %c4_i32 : i32 to vector<8x12xi32>
    %28 = arith.cmpi slt, %26, %27 : vector<8x12xi32>
    %c4_i32_19 = arith.constant 4 : i32
    %29 = vector.broadcast %c4_i32_19 : i32 to vector<8x12xi32>
    %30 = arith.cmpi sge, %26, %29 : vector<8x12xi32>
    %c8_i32 = arith.constant 8 : i32
    %31 = vector.broadcast %c8_i32 : i32 to vector<8x12xi32>
    %32 = arith.cmpi slt, %26, %31 : vector<8x12xi32>
    %33 = arith.andi %30, %32 : vector<8x12xi1>
    %cst_20 = arith.constant -1.000000e+30 : f32
    %34 = vector.broadcast %cst_20 : f32 to vector<8x12xf32>
    %35 = arith.select %28, %25, %34 : vector<8x12xi1>, vector<8x12xf32>
    %cst_21 = arith.constant dense<0xFF800000> : vector<8xf32>
    %36 = vector.multi_reduction <maximumf>, %35, %cst_21 [1] : vector<8x12xf32> to vector<8xf32>
    %37 = vector.shape_cast %36 : vector<8xf32> to vector<8x1xf32>
    %38 = vector.broadcast %37 : vector<8x1xf32> to vector<8x12xf32>
    %39 = arith.subf %35, %38 : vector<8x12xf32>
    %40 = math.exp %39 : vector<8x12xf32>
    %cst_22 = arith.constant 0.000000e+00 : f32
    %41 = vector.broadcast %cst_22 : f32 to vector<8x12xf32>
    %42 = arith.select %28, %40, %41 : vector<8x12xi1>, vector<8x12xf32>
    %cst_23 = arith.constant dense<0.000000e+00> : vector<8xf32>
    %43 = vector.multi_reduction <add>, %42, %cst_23 [1] : vector<8x12xf32> to vector<8xf32>
    %44 = vector.shape_cast %43 : vector<8xf32> to vector<8x1xf32>
    %45 = vector.broadcast %44 : vector<8x1xf32> to vector<8x12xf32>
    %46 = arith.divf %42, %45 : vector<8x12xf32>
    %cst_24 = arith.constant 0.000000e+00 : f32
    %47 = vector.broadcast %cst_24 : f32 to vector<8x12xf32>
    %48 = arith.maximumf %25, %47 : vector<8x12xf32>
    %49 = math.absf %25 : vector<8x12xf32>
    %cst_25 = arith.constant 0.000000e+00 : f32
    %50 = vector.broadcast %cst_25 : f32 to vector<8x12xf32>
    %51 = arith.subf %50, %49 : vector<8x12xf32>
    %52 = math.exp %51 : vector<8x12xf32>
    %53 = math.log1p %52 : vector<8x12xf32>
    %54 = arith.addf %48, %53 : vector<8x12xf32>
    %55 = arith.select %33, %25, %54 : vector<8x12xi1>, vector<8x12xf32>
    %56 = arith.select %28, %46, %55 : vector<8x12xi1>, vector<8x12xf32>
    %c0_26 = arith.constant 0 : index
    %c0_27 = arith.constant 0 : index
    %57 = vector.load %arg8[%c0_26, %c0_27] : memref<8x12xf32, #tpu.memory_space<vmem>>, vector<8x12xf32>
    tpu.vector_store %arg8[%c0_26, %c0_27], %56 {strides = array<i32>} : memref<8x12xf32, #tpu.memory_space<vmem>>, vector<8x12xf32>,
    return
  }
  func.func @transform_0(%arg0: i32) -> (i32, i32) {
    %c0_i32 = arith.constant 0 : i32
    %c0_i32_0 = arith.constant 0 : i32
    return %arg0, %c0_i32 : i32, i32
  }
  func.func @transform_1(%arg0: i32) -> (i32, i32) {
    %c0_i32 = arith.constant 0 : i32
    %c0_i32_0 = arith.constant 0 : i32
    %c0_i32_1 = arith.constant 0 : i32
    return %c0_i32, %c0_i32_0 : i32, i32
  }
  func.func @transform_2(%arg0: i32) -> (i32, i32) {
    %c0_i32 = arith.constant 0 : i32
    %c0_i32_0 = arith.constant 0 : i32
    %c0_i32_1 = arith.constant 0 : i32
    return %c0_i32, %c0_i32_0 : i32, i32
  }
  func.func @transform_3(%arg0: i32) -> (i32, i32) {
    %c0_i32 = arith.constant 0 : i32
    %c0_i32_0 = arith.constant 0 : i32
    %c0_i32_1 = arith.constant 0 : i32
    return %c0_i32, %c0_i32_0 : i32, i32
  }
  func.func @transform_4(%arg0: i32) -> (i32, i32) {
    %c0_i32 = arith.constant 0 : i32
    %c0_i32_0 = arith.constant 0 : i32
    %c0_i32_1 = arith.constant 0 : i32
    return %c0_i32, %c0_i32_0 : i32, i32
  }
  func.func @transform_5(%arg0: i32) -> (i32, i32) {
    %c0_i32 = arith.constant 0 : i32
    %c0_i32_0 = arith.constant 0 : i32
    %c0_i32_1 = arith.constant 0 : i32
    return %c0_i32, %c0_i32_0 : i32, i32
  }
  func.func @transform_6(%arg0: i32) -> (i32, i32) {
    %c0_i32 = arith.constant 0 : i32
    %c0_i32_0 = arith.constant 0 : i32
    %c0_i32_1 = arith.constant 0 : i32
    return %c0_i32, %c0_i32_0 : i32, i32
  }
  func.func @transform_7(%arg0: i32) -> (i32, i32) {
    %c0_i32 = arith.constant 0 : i32
    %c0_i32_0 = arith.constant 0 : i32
    return %arg0, %c0_i32 : i32, i32
  }
}

</mosaic_0001>

<bundles_post_ra>
// kernel: tpu_custom_call.1
= control target key start
LH: loop header
LB: loop body
LE: loop exit
PB: predicated region body
PF: predicated region fallthrough
CT: control target
= control target key end

     0   :  { %12 = vsyncpa [#allocation3], 0  ;;  %s561_s0 = inlined_call_operand.hbm [shape: f32[8,16], index: 0, kind: input, shape index: {}]   ;;  %s562_s1 = inlined_call_operand.vmem [shape: f32[16,32], index: 1, kind: input, shape index: {}]   ;;  %s563_s2 = inlined_call_operand.vmem [shape: f32[1,32], index: 2, kind: input, shape index: {}]   ;;  %s564_s3 = inlined_call_operand.vmem [shape: f32[32,32], index: 3, kind: input, shape index: {}]   ;;  %s565_s4 = inlined_call_operand.vmem [shape: f32[1,32], index: 4, kind: input, shape index: {}]   ;;  %s566_s5 = inlined_call_operand.vmem [shape: f32[32,12], index: 5, kind: input, shape index: {}]   ;;  %s567_s6 = inlined_call_operand.vmem [shape: f32[1,12], index: 6, kind: input, shape index: {}]   ;;  %s568_s7 = inlined_call_operand.hbm [shape: f32[8,12], index: 7, kind: output, shape index: {}]  }
   0x1   :  { %13 = vsyncpa [#allocation4], 0  ;;  %s455_s24 = smov [#allocation2]  }
   0x2   :  { %s20_s25 = sshll.u32 %s455_s24, 4  ;;  %s21_s25 = int_to_ptr.vmem [resolvable:$true] %s20_s25 }
   0x3   :  { %s419_s26 = scalar_lea.vmem %s21_s25, 128  ;;  %p424_p1 = scmp.lt.s32.totalorder %s21_s25, %s21_s25 }
   0x4   :  { %p420_p0 = scmp.ne.s32.totalorder %s21_s25, %s419_s26  ;;  %p425_p2 = scmp.lt.s32.totalorder %s419_s26, %s419_s26 }
   0x6   :  { %p426_p3 = por %p425_p2, %p424_p1 }
   0x8   :  { %p427_p4 = pnand %p426_p3, %p420_p0 }
   0xa   :  { %430 = shalt.err (!%p427_p4)
}
   0xb   :  { %23 = dma.hbm_to_vmem [thread:$0]  %s561_s0, 128, %s21_s25, [#allocation3]  }
   0xc   :  { %451 = dma.done.wait [#allocation3], 128  }
   0xd   :  { %452 = vsyncadd [#allocation3], 4294967168  ;;  %v456_v0 = vmov 0.0   ;;  %vm457_vm0 = vmmov 0   ;;  %v41_v1 = vld [vmem:[%s562_s1 + $0x8] sm:$0xff]  ;;  %v40_v2 = vld [vmem:[%s562_s1] sm:$0xff]  ;;  %v298_v24 = vlaneseq }
   0xe   :  { %370 = vmatprep.subr.mxu0 %v456_v0  ;;  %374 = vmatprep.mubr.msk.f32.mxu0 %vm457_vm0, %v456_v0  ;;  %v39_v3 = vld [vmem:[#allocation2] sm:$0xff]  ;;  %vm49_vm1 = vcmask 130048   ;;  %v129_v4 = vld [vmem:[%s564_s3 + $0x18] sm:$0xff]  ;;  %v128_v5 = vld [vmem:[%s564_s3 + $0x10] sm:$0xff]  ;;  %vm137_vm3 = vcmask 261120   ;;  %vm305_vm6 = vcmask 97280  }
   0xf   :  { %377 = vmatprep.subr.mxu1 %v456_v0  ;;  %385 = vmatprep.mubr.msk.f32.mxu1 %vm457_vm0, %v456_v0  ;;  %v127_v6 = vld [vmem:[%s564_s3 + $0x8] sm:$0xff]  ;;  %v126_v7 = vld [vmem:[%s564_s3] sm:$0xff]  ;;  %v217_v8 = vld [vmem:[%s566_s5 + $0x18] sm:$0xff]  ;;  %v299_v25 = vand.u32 127, %v298_v24 }
  0x10   :  { %371 = vmatpush3.msra.mxu0 %v41_v1  ;;  %378 = vmatpush3.msra.mxu1 %v129_v4  ;;  %v351_v9 = vld [vmem:[%s563_s2] ss:$0 sm:$0xff]  ;;  %v216_v15 = vld [vmem:[%s566_s5 + $0x10] sm:$0xff]  ;;  %v215_v16 = vld [vmem:[%s566_s5 + $0x8] sm:$0xff] }
  0x11   :  { %372 = vmatprep.subr.mxu0 %v456_v0  ;;  %379 = vmatprep.subr.mxu1 %v456_v0  ;;  %v214_v17 = vld [vmem:[%s566_s5] sm:$0xff]  ;;  %vm300_vm5 = vcmp.lt.s32.totalorder %v299_v25, 4  ;;  %vm301_vm7 = vcmp.ge.s32.totalorder %v299_v25, 4  ;;  %vm302_vm8 = vcmp.lt.s32.totalorder %v299_v25, 8 }
  0x12   :  { %373 = vmatpush3.msra.mxu0 %v40_v2  ;;  %380 = vmatpush3.msra.mxu1 %v128_v5  ;;  %v353_v18 = vld [vmem:[%s565_s4] ss:$0 sm:$0xff]  ;;  %vm548_vm10 = vmand %vm301_vm7, %vm302_vm8  ;;  %s458_s4 = smov [#allocation5]  }
  0x13   :  { %375 = vmatmul.mubr.msk.f32.vlgmr.msra.gmra.mxu0 %vm49_vm1, %v39_v3  ;;  %388 = vmatprep.subr.mxu0 %v456_v0  ;;  %v355_v26 = vld [vmem:[%s567_s6] ss:$0 sm:$0xff]  ;;  %s342_s5 = sshll.u32 %s458_s4, 4  ;;  %s343_s5 = int_to_ptr.vmem [resolvable:$true] %s342_s5 }
  0x14   :  { %396 = vmatprep.mubr.msk.f32.mxu0 %vm457_vm0, %v456_v0  ;;  %381 = vmatprep.subr.mxu1 %v456_v0  ;;  %s431_s6 = scalar_lea.vmem %s343_s5, 128  ;;  %p436_p6 = scmp.lt.s32.totalorder %s343_s5, %s343_s5 }
  0x15   :  { %382 = vmatpush3.msra.mxu1 %v127_v6  ;;  %389 = vmatpush3.msra.mxu0 %v217_v8  ;;  %p432_p5 = scmp.ne.s32.totalorder %s343_s5, %s431_s6  ;;  %p437_p7 = scmp.lt.s32.totalorder %s431_s6, %s431_s6 }
  0x16   :  { %383 = vmatprep.subr.mxu1 %v456_v0  ;;  %390 = vmatprep.subr.mxu0 %v456_v0 }
  0x17   :  { %384 = vmatpush3.msra.mxu1 %v126_v7  ;;  %391 = vmatpush3.msra.mxu0 %v216_v15  ;;  %p438_p8 = por %p437_p7, %p436_p6 }
  0x18   :  { %392 = vmatprep.subr.mxu0 %v456_v0 }
  0x19   :  { %393 = vmatpush3.msra.mxu0 %v215_v16  ;;  %p439_p9 = pnand %p438_p8, %p432_p5 }
  0x1a   :  { %394 = vmatprep.subr.mxu0 %v456_v0 }
  0x1b   :  { %395 = vmatpush3.msra.mxu0 %v214_v17 }
  0xd3   :  { %v119_v10 = vpop.f32.mrf.mxu0 }
  0xd4   :  { %v120_v11 = vadd.f32 %v351_v9, %v119_v10 }
  0xd5   :  { %v376_v12 = vpop.f32.mrf.mxu0 }
  0xd6   :  { %vm123_vm2 = vcmp.gt.f32.partialorder %v120_v11, 0.0  ;;  %v124_v13 = vmul.f32 0.01, %v120_v11 }
  0xd8   :  { %v125_v14 = vsel %vm123_vm2, %v120_v11, %v124_v13 }
  0xd9   :  { %386 = vmatmul.mubr.msk.f32.vlgmr.msra.gmra.mxu1 %vm137_vm3, %v125_v14 }
 0x199   :  { %v207_v19 = vpop.f32.mrf.mxu1 }
 0x19a   :  { %v208_v20 = vadd.f32 %v353_v18, %v207_v19 }
 0x19b   :  { %v387_v21 = vpop.f32.mrf.mxu1 }
 0x19c   :  { %vm211_vm4 = vcmp.gt.f32.partialorder %v208_v20, 0.0  ;;  %v212_v22 = vmul.f32 0.01, %v208_v20 }
 0x19e   :  { %v213_v23 = vsel %vm211_vm4, %v208_v20, %v212_v22 }
 0x19f   :  { %397 = vmatmul.mubr.msk.f32.vlgmr.msra.gmra.mxu0 %vm137_vm3, %v213_v23 }
 0x25f   :  { %v294_v27 = vpop.f32.mrf.mxu0 }
 0x260   :  { %v295_v28 = vadd.f32 %v355_v26, %v294_v27 }
 0x261   :  { %v398_v29 = vpop.f32.mrf.mxu0 }
 0x262   :  { %v319_v30 = vand.u32 2147483647, %v295_v28  ;;  %v304_v31 = vsel %vm300_vm5, %v295_v28, -1e+30  ;;  %v318_v43 = vmax.f32 %v295_v28, 0.0 }
 0x263   :  { %v306_v32 = vsel %vm305_vm6, %v304_v31, -inf }
 0x264   :  { %v320_v33 = vsub.f32 0.0, %v319_v30  ;;  %307 = vmax.xlane.f32.xlu0 %v306_v32 }
 0x266   :  { %v321_v34 = vmul.f32 1.442695, %v320_v33 }
 0x268   :  { %403 = vpow2.f32 %v321_v34 }
 0x275   :  { %v404_v35 = vpop.eup %403 }
 0x276   :  { %v323_v36 = vadd.f32 1.0, %v404_v35  ;;  %v326_v37 = vmul.f32 -0.5, %v404_v35  ;;  %v329_v39 = vand.u32 2147483647, %v404_v35 }
 0x278   :  { %405 = vlog2.f32 %v323_v36  ;;  %v327_v38 = vadd.f32 1.0, %v326_v37  ;;  %vm330_vm9 = vcmp.lt.f32.partialorder %v329_v39, 0.0004427343 }
 0x27a   :  { %v328_v42 = vmul.f32 %v404_v35, %v327_v38 }
 0x285   :  { %v406_v40 = vpop.eup %405 }
 0x286   :  { %v325_v41 = vmul.f32 0.6931472, %v406_v40 }
 0x288   :  { %v331_v44 = vsel %vm330_vm9, %v328_v42, %v325_v41 }
 0x289   :  { %v332_v46 = vadd.f32 %v331_v44, %v318_v43 }
 0x28b   :  { %v333_v47 = vsel %vm548_vm10, %v295_v28, %v332_v46 }
 0x2ed   :  { %v308_v48 = vpop.xlane.xlu0 %307 }
 0x2ee   :  { %v309_v49 = vsub.f32 %v304_v31, %v308_v48 }
 0x2f0   :  { %v310_v50 = vmul.f32 1.442695, %v309_v49 }
 0x2f2   :  { %407 = vpow2.f32 %v310_v50 }
 0x2ff   :  { %v408_v51 = vpop.eup %407 }
 0x300   :  { %v312_v52 = vsel %vm300_vm5, %v408_v51, 0.0 }
 0x301   :  { %v313_v53 = vsel %vm305_vm6, %v312_v52, 0.0 }
 0x302   :  { %314 = vadd.xlane.f32.xlu0 %v313_v53 }
 0x38b   :  { %v315_v54 = vpop.xlane.xlu0 %314 }
 0x38c   :  { %409 = vrcp.f32 %v315_v54 }
 0x399   :  { %v410_v55 = vpop.eup %409 }
 0x39a   :  { %v317_v56 = vmul.f32 %v410_v55, %v312_v52 }
 0x39c   :  { %v334_v57 = vsel %vm300_vm5, %v317_v56, %v333_v47 }
 0x39d   :  { %335 = vst.msk [vmem:[#allocation5] sm:$0xff] %vm305_vm6, %v334_v57 }
 0x39e   :  { %442 = shalt.err (!%p439_p9)
}
 0x39f   :  { %345 = dma.vmem_to_hbm [thread:$0]  %s343_s5, 128, %s568_s7, [#allocation4]  }
 0x3a0   :  { %453 = dma.done.wait [#allocation4], 128  }
 0x3a1   :  { %454 = vsyncadd [#allocation4], 4294967168 }
 0x3a2   :  { %349 = vsyncpa [#allocation3], 1 }
 0x3a3   :  { %350 = vsyncpa [#allocation4], 1 }

</bundles_post_ra>
